<compile_context>
chip_gen: v5e
topology: v5e:2x2
jax: 0.10.0
libtpu: 0.0.40
codegen_flags: <defaults>
</compile_context>

<pallas_src>
import jax
import jax.numpy as jnp
from jax.experimental import pallas as pl
from jax.experimental.pallas import tpu as pltpu


def _round_up(x, m):
    return ((x + m - 1) // m) * m


def _decision_kernel(pred_ref, prey_ref, cave_ref,
                     w1_ref, b1_ref, w2_ref, b2_ref, out_ref):
    # Layer 1: fused "concat" -> three accumulated matmuls over W1 row-slices.
    h = jnp.dot(pred_ref[...], w1_ref[0], preferred_element_type=jnp.float32)
    h = h + jnp.dot(prey_ref[...], w1_ref[1], preferred_element_type=jnp.float32)
    h = h + jnp.dot(cave_ref[...], w1_ref[2], preferred_element_type=jnp.float32)
    h = jnp.maximum(h + b1_ref[...], 0.0)
    # Layer 2: lane-padded matmul + bias + ReLU, lane-dense store.
    y = jnp.dot(h, w2_ref[...], preferred_element_type=jnp.float32) + b2_ref[...]
    out_ref[...] = jnp.maximum(y, 0.0)


def prepare_decision_params(w1, b1, w2, b2):
    """One-time weight prep (hoisted out of the per-call path).

    w1: (3*P, H), b1: (H,) or (1, H), w2: (H, O), b2: (O,) or (1, O)
    (weights stored pre-transposed as (in, out)).
    Returns a dict of lane-padded, reshaped parameters + real dims.
    """
    F_in, H = w1.shape
    assert F_in % 3 == 0, "first layer expects 3 * num_pixels input features"
    P = F_in // 3
    O = w2.shape[-1]

    H_pad = _round_up(H, 128)
    O_pad = _round_up(O, 128)

    w1_pad = jnp.pad(w1, ((0, 0), (0, H_pad - H))).reshape(3, P, H_pad)
    b1_pad = jnp.pad(b1.reshape(1, H), ((0, 0), (0, H_pad - H)))
    w2_pad = jnp.pad(w2, ((0, H_pad - H), (0, O_pad - O)))   # padded rows zero
    b2_pad = jnp.pad(b2.reshape(1, O), ((0, 0), (0, O_pad - O)))

    return {
        "w1": w1_pad, "b1": b1_pad, "w2": w2_pad, "b2": b2_pad,
        "P": P, "H": H, "O": O, "H_pad": H_pad, "O_pad": O_pad,
    }


def _pick_batch_tile(B):
    """Batch-tile heuristic.

    - multiple of 8 (f32 sublane) unless the tile equals the whole batch,
    - up to 1024 rows (big tiles amortize the ~0.35 us/step overhead; at 1024
      the double-buffered footprint is ~7.5 MiB, inside every generation's
      scoped VMEM default, incl. v5e's 16 MiB and v7x's 32 MiB),
    - >= 2 grid steps when B > 8 so v7x's 'parallel' axis can use both
      TensorCores (one extra step is noise on single-TC v5e/v6e).
    """
    if B <= 8:
        return B                      # single tile; block dim == full array dim
    tb = max(8, _round_up(pl.cdiv(B, 2), 8))
    return min(tb, 1024)


def pred_prey_decision(pred, prey, cave, params, *, batch_tile=None):
    """Forward pass. pred/prey/cave: (B, P) (f32 or bf16). Returns (B, O) f32."""
    if pred.ndim == 1:
        pred = pred[None, :]
    if prey.ndim == 1:
        prey = prey[None, :]
    if cave.ndim == 1:
        cave = cave[None, :]

    B, P = pred.shape
    assert P == params["P"], "num_pixels mismatch with prepared params"
    H, O = params["H"], params["O"]
    H_pad, O_pad = params["H_pad"], params["O_pad"]
    w1_pad, b1_pad = params["w1"], params["b1"]
    w2_pad, b2_pad = params["w2"], params["b2"]

    TB = _pick_batch_tile(B) if batch_tile is None else batch_tile
    if TB != B:
        assert TB % 8 == 0, "batch_tile must be a multiple of 8 (or equal to B)"
    grid = (pl.cdiv(B, TB),)

    act_spec = lambda cols: pl.BlockSpec((TB, cols), lambda i: (i, 0))
    resident = lambda shape: pl.BlockSpec(shape, lambda i: (0,) * len(shape))

    act_bytes = pred.dtype.itemsize
    weight_bytes = sum(int(a.size) * a.dtype.itemsize
                       for a in (w1_pad, b1_pad, w2_pad, b2_pad))
    cost = pl.CostEstimate(
        flops=2 * B * (3 * P * H + H * O),
        transcendentals=0,
        bytes_accessed=B * (3 * P * act_bytes + O_pad * 4) + weight_bytes,
    )

    out = pl.pallas_call(
        _decision_kernel,
        out_shape=jax.ShapeDtypeStruct((B, O_pad), jnp.float32),
        grid=grid,
        in_specs=[
            act_spec(P),                    # pred tile
            act_spec(P),                    # prey tile
            act_spec(P),                    # cave tile
            resident((3, P, H_pad)),        # w1 (VMEM-resident across grid)
            resident((1, H_pad)),           # b1
            resident((H_pad, O_pad)),       # w2
            resident((1, O_pad)),           # b2
        ],
        out_specs=act_spec(O_pad),
        compiler_params=pltpu.CompilerParams(
            dimension_semantics=("parallel",)),
        cost_estimate=cost,
    )(pred, prey, cave, w1_pad, b1_pad, w2_pad, b2_pad)

    return out[:, :O]


def _reference(pred, prey, cave, w1, b1, w2, b2):
    tags = jnp.concatenate([pred, prey, cave], axis=1)
    h = jnp.maximum(tags @ w1 + b1, 0.0)
    return jnp.maximum(h @ w2 + b2, 0.0)


if __name__ == "__main__":
    # Small shapes consistent with the module: imageSize=16 -> num_pixels=256.
    B = 2
    image_size = 16
    num_pixels = image_size * image_size          # 256
    H_decision = 32

    key = jax.random.PRNGKey(0)
    k_pred, k_prey, k_cave, k_w1, k_b1, k_w2, k_b2 = jax.random.split(key, 7)

    pred = jax.random.normal(k_pred, (B, num_pixels), dtype=jnp.float32)
    prey = jax.random.normal(k_prey, (B, num_pixels), dtype=jnp.float32)
    cave = jax.random.normal(k_cave, (B, num_pixels), dtype=jnp.float32)

    # Deterministic parameter init (nn.Linear-style uniform bounds),
    # stored pre-transposed as (in, out).
    fan_in1 = 3 * num_pixels
    lim1 = 1.0 / jnp.sqrt(fan_in1)
    w1 = jax.random.uniform(k_w1, (fan_in1, H_decision), jnp.float32, -lim1, lim1)
    b1 = jax.random.uniform(k_b1, (1, H_decision), jnp.float32, -lim1, lim1)

    lim2 = 1.0 / jnp.sqrt(H_decision)
    w2 = jax.random.uniform(k_w2, (H_decision, 2), jnp.float32, -lim2, lim2)
    b2 = jax.random.uniform(k_b2, (1, 2), jnp.float32, -lim2, lim2)

    # One-time weight prep (padding hoisted out of the per-call path).
    params = prepare_decision_params(w1, b1, w2, b2)

    out = pred_prey_decision(pred, prey, cave, params)
    out = jax.block_until_ready(out)

    ref = _reference(pred, prey, cave, w1, b1, w2, b2)
    assert out.shape == (B, 2)
    assert jnp.allclose(out, ref, atol=1e-5, rtol=1e-5)

    print("KERNEL_OK")
</pallas_src>

<mosaic_0001>
module attributes {stable_mosaic.version = 11 : i64} {
  func.func @_decision_kernel(%arg0: i32, %arg1: memref<2x256xf32, #tpu.memory_space<vmem>>, %arg2: memref<2x256xf32, #tpu.memory_space<vmem>>, %arg3: memref<2x256xf32, #tpu.memory_space<vmem>>, %arg4: memref<3x256x128xf32, #tpu.memory_space<vmem>>, %arg5: memref<1x128xf32, #tpu.memory_space<vmem>>, %arg6: memref<128x128xf32, #tpu.memory_space<vmem>>, %arg7: memref<1x128xf32, #tpu.memory_space<vmem>>, %arg8: memref<2x128xf32, #tpu.memory_space<vmem>>) attributes {dimension_semantics = [#tpu.dimension_semantics<parallel>], iteration_bounds = array<i64: 1>, scalar_prefetch = 0 : i64, scratch_operands = 0 : i64, tpu.core_type = #tpu.core_type<tc>, window_params = [{transform_indices = @transform_0, window_bounds = array<i64: 2, 256>}, {transform_indices = @transform_1, window_bounds = array<i64: 2, 256>}, {transform_indices = @transform_2, window_bounds = array<i64: 2, 256>}, {pipeline_mode = #tpu.pipeline_mode<synchronous>, transform_indices = @transform_3, window_bounds = array<i64: 3, 256, 128>}, {pipeline_mode = #tpu.pipeline_mode<synchronous>, transform_indices = @transform_4, window_bounds = array<i64: 1, 128>}, {pipeline_mode = #tpu.pipeline_mode<synchronous>, transform_indices = @transform_5, window_bounds = array<i64: 128, 128>}, {pipeline_mode = #tpu.pipeline_mode<synchronous>, transform_indices = @transform_6, window_bounds = array<i64: 1, 128>}, {transform_indices = @transform_7, window_bounds = array<i64: 2, 128>}]} {
    %c0 = arith.constant 0 : index
    %c0_0 = arith.constant 0 : index
    %0 = vector.load %arg1[%c0, %c0_0] : memref<2x256xf32, #tpu.memory_space<vmem>>, vector<2x256xf32>
    %c0_1 = arith.constant 0 : index
    %c0_2 = arith.constant 0 : index
    %c0_3 = arith.constant 0 : index
    %1 = vector.load %arg4[%c0_1, %c0_2, %c0_3] : memref<3x256x128xf32, #tpu.memory_space<vmem>>, vector<1x256x128xf32>
    %2 = vector.shape_cast %1 : vector<1x256x128xf32> to vector<256x128xf32>
    %cst = arith.constant dense<0.000000e+00> : vector<2x128xf32>
    %3 = tpu.matmul %0, %2, %cst {dimension_numbers = #tpu.dot_dimension_numbers<[1], [0], [0], [1], [0, 0, 1, 1], [], []>} : vector<2x256xf32>, vector<256x128xf32>, vector<2x128xf32> -> vector<2x128xf32>
    %c0_4 = arith.constant 0 : index
    %c0_5 = arith.constant 0 : index
    %4 = vector.load %arg2[%c0_4, %c0_5] : memref<2x256xf32, #tpu.memory_space<vmem>>, vector<2x256xf32>
    %c1 = arith.constant 1 : index
    %c0_6 = arith.constant 0 : index
    %c0_7 = arith.constant 0 : index
    %5 = vector.load %arg4[%c1, %c0_6, %c0_7] : memref<3x256x128xf32, #tpu.memory_space<vmem>>, vector<1x256x128xf32>
    %6 = vector.shape_cast %5 : vector<1x256x128xf32> to vector<256x128xf32>
    %cst_8 = arith.constant dense<0.000000e+00> : vector<2x128xf32>
    %7 = tpu.matmul %4, %6, %cst_8 {dimension_numbers = #tpu.dot_dimension_numbers<[1], [0], [0], [1], [0, 0, 1, 1], [], []>} : vector<2x256xf32>, vector<256x128xf32>, vector<2x128xf32> -> vector<2x128xf32>
    %8 = arith.addf %3, %7 : vector<2x128xf32>
    %c0_9 = arith.constant 0 : index
    %c0_10 = arith.constant 0 : index
    %9 = vector.load %arg3[%c0_9, %c0_10] : memref<2x256xf32, #tpu.memory_space<vmem>>, vector<2x256xf32>
    %c2 = arith.constant 2 : index
    %c0_11 = arith.constant 0 : index
    %c0_12 = arith.constant 0 : index
    %10 = vector.load %arg4[%c2, %c0_11, %c0_12] : memref<3x256x128xf32, #tpu.memory_space<vmem>>, vector<1x256x128xf32>
    %11 = vector.shape_cast %10 : vector<1x256x128xf32> to vector<256x128xf32>
    %cst_13 = arith.constant dense<0.000000e+00> : vector<2x128xf32>
    %12 = tpu.matmul %9, %11, %cst_13 {dimension_numbers = #tpu.dot_dimension_numbers<[1], [0], [0], [1], [0, 0, 1, 1], [], []>} : vector<2x256xf32>, vector<256x128xf32>, vector<2x128xf32> -> vector<2x128xf32>
    %13 = arith.addf %8, %12 : vector<2x128xf32>
    %c0_14 = arith.constant 0 : index
    %c0_15 = arith.constant 0 : index
    %14 = vector.load %arg5[%c0_14, %c0_15] : memref<1x128xf32, #tpu.memory_space<vmem>>, vector<1x128xf32>
    %15 = vector.broadcast %14 : vector<1x128xf32> to vector<2x128xf32>
    %16 = arith.addf %13, %15 : vector<2x128xf32>
    %cst_16 = arith.constant 0.000000e+00 : f32
    %17 = vector.broadcast %cst_16 : f32 to vector<2x128xf32>
    %18 = arith.maximumf %16, %17 : vector<2x128xf32>
    %c0_17 = arith.constant 0 : index
    %c0_18 = arith.constant 0 : index
    %19 = vector.load %arg6[%c0_17, %c0_18] : memref<128x128xf32, #tpu.memory_space<vmem>>, vector<128x128xf32>
    %cst_19 = arith.constant dense<0.000000e+00> : vector<2x128xf32>
    %20 = tpu.matmul %18, %19, %cst_19 {dimension_numbers = #tpu.dot_dimension_numbers<[1], [0], [0], [1], [0, 0, 1, 1], [], []>} : vector<2x128xf32>, vector<128x128xf32>, vector<2x128xf32> -> vector<2x128xf32>
    %c0_20 = arith.constant 0 : index
    %c0_21 = arith.constant 0 : index
    %21 = vector.load %arg7[%c0_20, %c0_21] : memref<1x128xf32, #tpu.memory_space<vmem>>, vector<1x128xf32>
    %22 = vector.broadcast %21 : vector<1x128xf32> to vector<2x128xf32>
    %23 = arith.addf %20, %22 : vector<2x128xf32>
    %cst_22 = arith.constant 0.000000e+00 : f32
    %24 = vector.broadcast %cst_22 : f32 to vector<2x128xf32>
    %25 = arith.maximumf %23, %24 : vector<2x128xf32>
    %c0_23 = arith.constant 0 : index
    %c0_24 = arith.constant 0 : index
    %26 = vector.load %arg8[%c0_23, %c0_24] : memref<2x128xf32, #tpu.memory_space<vmem>>, vector<2x128xf32>
    tpu.vector_store %arg8[%c0_23, %c0_24], %25 {strides = array<i32>} : memref<2x128xf32, #tpu.memory_space<vmem>>, vector<2x128xf32>,
    return
  }
  func.func @transform_0(%arg0: i32) -> (i32, i32) {
    %c0_i32 = arith.constant 0 : i32
    %c0_i32_0 = arith.constant 0 : i32
    return %arg0, %c0_i32 : i32, i32
  }
  func.func @transform_1(%arg0: i32) -> (i32, i32) {
    %c0_i32 = arith.constant 0 : i32
    %c0_i32_0 = arith.constant 0 : i32
    return %arg0, %c0_i32 : i32, i32
  }
  func.func @transform_2(%arg0: i32) -> (i32, i32) {
    %c0_i32 = arith.constant 0 : i32
    %c0_i32_0 = arith.constant 0 : i32
    return %arg0, %c0_i32 : i32, i32
  }
  func.func @transform_3(%arg0: i32) -> (i32, i32, i32) {
    %c0_i32 = arith.constant 0 : i32
    %c0_i32_0 = arith.constant 0 : i32
    %c0_i32_1 = arith.constant 0 : i32
    %c0_i32_2 = arith.constant 0 : i32
    return %c0_i32, %c0_i32_0, %c0_i32_1 : i32, i32, i32
  }
  func.func @transform_4(%arg0: i32) -> (i32, i32) {
    %c0_i32 = arith.constant 0 : i32
    %c0_i32_0 = arith.constant 0 : i32
    %c0_i32_1 = arith.constant 0 : i32
    return %c0_i32, %c0_i32_0 : i32, i32
  }
  func.func @transform_5(%arg0: i32) -> (i32, i32) {
    %c0_i32 = arith.constant 0 : i32
    %c0_i32_0 = arith.constant 0 : i32
    %c0_i32_1 = arith.constant 0 : i32
    return %c0_i32, %c0_i32_0 : i32, i32
  }
  func.func @transform_6(%arg0: i32) -> (i32, i32) {
    %c0_i32 = arith.constant 0 : i32
    %c0_i32_0 = arith.constant 0 : i32
    %c0_i32_1 = arith.constant 0 : i32
    return %c0_i32, %c0_i32_0 : i32, i32
  }
  func.func @transform_7(%arg0: i32) -> (i32, i32) {
    %c0_i32 = arith.constant 0 : i32
    %c0_i32_0 = arith.constant 0 : i32
    return %arg0, %c0_i32 : i32, i32
  }
}

</mosaic_0001>

<bundles_post_ra>
// kernel: tpu_custom_call.1
= control target key start
LH: loop header
LB: loop body
LE: loop exit
PB: predicated region body
PF: predicated region fallthrough
CT: control target
= control target key end

     0   :  { %12 = vsyncpa [#allocation3], 0  ;;  %s640_s0 = inlined_call_operand.hbm [shape: f32[2,256], index: 0, kind: input, shape index: {}]   ;;  %s641_s1 = inlined_call_operand.hbm [shape: f32[2,256], index: 1, kind: input, shape index: {}]   ;;  %s642_s2 = inlined_call_operand.hbm [shape: f32[2,256], index: 2, kind: input, shape index: {}]   ;;  %s643_s3 = inlined_call_operand.hbm [shape: f32[3,256,128], index: 3, kind: input, shape index: {}]   ;;  %s644_s4 = inlined_call_operand.vmem [shape: f32[1,128], index: 4, kind: input, shape index: {}]   ;;  %s645_s5 = inlined_call_operand.hbm [shape: f32[128,128], index: 5, kind: input, shape index: {}]   ;;  %s646_s6 = inlined_call_operand.vmem [shape: f32[1,128], index: 6, kind: input, shape index: {}]   ;;  %s647_s7 = inlined_call_operand.hbm [shape: f32[2,128], index: 7, kind: output, shape index: {}]  }
   0x1   :  { %13 = vsyncpa [#allocation6], 0 }
   0x2   :  { %14 = vsyncpa [#allocation9], 0  ;;  %s32_s26 = sshll.u32 %s641_s1, 4  ;;  %s33_s26 = int_to_ptr.hbm [resolvable:$true] %s32_s26 }
   0x3   :  { %15 = vsyncpa [#allocation4], 0  ;;  %s568_s27 = smov [#allocation5]   ;;  %s53_s8 = sshll.u32 %s643_s3, 4  ;;  %s54_s8 = int_to_ptr.hbm [resolvable:$true] %s53_s8 }
   0x4   :  { %s34_s28 = sshll.u32 %s568_s27, 4  ;;  %s569_s9 = smov [#allocation8]   ;;  %s35_s28 = int_to_ptr.vmem [resolvable:$true] %s34_s28 }
   0x5   :  { %37 = dma.hbm_to_vmem [thread:$0]  %s33_s26, 64, %s35_s28, [#allocation6]  }
   0x6   :  { %s55_s10 = sshll.u32 %s569_s9, 4  ;;  %s570_s11 = smov 128   ;;  %s56_s10 = int_to_ptr.vmem [resolvable:$true] %s55_s10 }
   0x7   :  { %s571_s12 = smov 8   ;;  %s21_s1 = sshll.u32 %s640_s0, 4  ;;  %s22_s1 = int_to_ptr.hbm [resolvable:$true] %s21_s1 }
   0x8   :  { %61 = dma.hbm_to_vmem [thread:$0]  %s54_s8, 12288, %s56_s10, [#allocation9], %s570_s11, %s570_s11, %s571_s12  }
   0x9   :  { %s572_s15 = smov [#allocation2]   ;;  %s43_s3 = sshll.u32 %s642_s2, 4  ;;  %s44_s3 = int_to_ptr.hbm [resolvable:$true] %s43_s3 }
   0xa   :  { %s23_s16 = sshll.u32 %s572_s15, 4  ;;  %s573_s19 = smov [#allocation7]   ;;  %s24_s16 = int_to_ptr.vmem [resolvable:$true] %s23_s16 }
   0xb   :  { %26 = dma.hbm_to_vmem [thread:$0]  %s22_s1, 64, %s24_s16, [#allocation3]  }
   0xc   :  { %s45_s20 = sshll.u32 %s573_s19, 4  ;;  %s68_s23 = sshll.u32 %s645_s5, 4  ;;  %s46_s20 = int_to_ptr.vmem [resolvable:$true] %s45_s20  ;;  %s69_s23 = int_to_ptr.hbm [resolvable:$true] %s68_s23 }
   0xd   :  { %48 = dma.hbm_to_vmem [thread:$0]  %s44_s3, 64, %s46_s20, [#allocation6]  }
   0xe   :  { %s574_s0 = smov [#allocation10]  }
   0xf   :  { %s70_s24 = sshll.u32 %s574_s0, 4  ;;  %s71_s24 = int_to_ptr.vmem [resolvable:$true] %s70_s24 }
  0x10   :  { %76 = dma.hbm_to_vmem [thread:$0]  %s69_s23, 2048, %s71_s24, [#allocation9], %s570_s11, %s570_s11, %s571_s12  }
  0x11   :  { %560 = dma.done.wait [#allocation3], 64  }
  0x12   :  { %561 = vsyncadd [#allocation3], 4294967232 }
  0x13   :  { %562 = dma.done.wait [#allocation6], 128  }
  0x14   :  { %563 = vsyncadd [#allocation6], 4294967168 }
  0x15   :  { %564 = dma.done.wait [#allocation9], 14336  }
  0x16   :  { %565 = vsyncadd [#allocation9], 4294952960  ;;  %v149_v0 = vld [vmem:[#allocation8 + $0x178] sm:$0xff]  ;;  %v148_v2 = vld [vmem:[#allocation8 + $0x170] sm:$0xff]  ;;  %s575_s27 = smov [#allocation11]   ;;  %s394_s8 = sshll.u32 %s647_s7, 4  ;;  %s395_s8 = int_to_ptr.hbm [resolvable:$true] %s394_s8 }
  0x17   :  { %v165_v1 = vld [vmem:[#allocation8 + $0x1f8] sm:$0xff]  ;;  %172 = vmatpush.msra.mxu0 %v149_v0  ;;  %v164_v3 = vld [vmem:[#allocation8 + $0x1f0] sm:$0xff]  ;;  %v147_v4 = vld [vmem:[#allocation8 + $0x168] sm:$0xff]  ;;  %s392_s28 = sshll.u32 %s575_s27, 4  ;;  %s393_s28 = int_to_ptr.vmem [resolvable:$true] %s392_s28 }
  0x18   :  { %192 = vmatpush.msra.mxu1 %v165_v1  ;;  %v163_v5 = vld [vmem:[#allocation8 + $0x1e8] sm:$0xff]  ;;  %v146_v6 = vld [vmem:[#allocation8 + $0x160] sm:$0xff]  ;;  %v145_v8 = vld [vmem:[#allocation8 + $0x158] sm:$0xff] }
  0x19   :  { %173 = vmatpush.msra.mxu0 %v148_v2  ;;  %v162_v7 = vld [vmem:[#allocation8 + $0x1e0] sm:$0xff]  ;;  %v161_v9 = vld [vmem:[#allocation8 + $0x1d8] sm:$0xff]  ;;  %v114_v11 = vld [vmem:[#allocation8 + $0x70] sm:$0xff] }
  0x1a   :  { %193 = vmatpush.msra.mxu1 %v164_v3  ;;  %v115_v10 = vld [vmem:[#allocation8 + $0x78] sm:$0xff]  ;;  %v144_v12 = vld [vmem:[#allocation8 + $0x150] sm:$0xff]  ;;  %v113_v15 = vld [vmem:[#allocation8 + $0x68] sm:$0xff] }
  0x1b   :  { %174 = vmatpush.msra.mxu0 %v147_v4  ;;  %v160_v13 = vld [vmem:[#allocation8 + $0x1d0] sm:$0xff]  ;;  %218 = vmatpush.msra.mxu2 %v115_v10  ;;  %v131_v14 = vld [vmem:[#allocation8 + $0xf8] sm:$0xff]  ;;  %v143_v17 = vld [vmem:[#allocation8 + $0x148] sm:$0xff] }
  0x1c   :  { %194 = vmatpush.msra.mxu1 %v163_v5  ;;  %v130_v16 = vld [vmem:[#allocation8 + $0xf0] sm:$0xff]  ;;  %v159_v18 = vld [vmem:[#allocation8 + $0x1c8] sm:$0xff]  ;;  %238 = vmatpush.msra.mxu3 %v131_v14  ;;  %v112_v19 = vld [vmem:[#allocation8 + $0x60] sm:$0xff] }
  0x1d   :  { %175 = vmatpush.msra.mxu0 %v146_v6  ;;  %219 = vmatpush.msra.mxu2 %v114_v11  ;;  %v129_v20 = vld [vmem:[#allocation8 + $0xe8] sm:$0xff]  ;;  %v142_v21 = vld [vmem:[#allocation8 + $0x140] sm:$0xff]  ;;  %v111_v23 = vld [vmem:[#allocation8 + $0x58] sm:$0xff] }
  0x1e   :  { %195 = vmatpush.msra.mxu1 %v162_v7  ;;  %v158_v22 = vld [vmem:[#allocation8 + $0x1c0] sm:$0xff]  ;;  %239 = vmatpush.msra.mxu3 %v130_v16  ;;  %v141_v25 = vld [vmem:[#allocation8 + $0x138] sm:$0xff]  ;;  %v110_v27 = vld [vmem:[#allocation8 + $0x50] sm:$0xff] }
  0x1f   :  { %176 = vmatpush.msra.mxu0 %v145_v8  ;;  %220 = vmatpush.msra.mxu2 %v113_v15  ;;  %v128_v24 = vld [vmem:[#allocation8 + $0xe0] sm:$0xff]  ;;  %v157_v26 = vld [vmem:[#allocation8 + $0x1b8] sm:$0xff]  ;;  %v140_v29 = vld [vmem:[#allocation8 + $0x130] sm:$0xff] }
  0x20   :  { %196 = vmatpush.msra.mxu1 %v161_v9  ;;  %240 = vmatpush.msra.mxu3 %v129_v20  ;;  %v127_v28 = vld [vmem:[#allocation8 + $0xd8] sm:$0xff]  ;;  %v156_v30 = vld [vmem:[#allocation8 + $0x1b0] sm:$0xff]  ;;  %v109_v31 = vld [vmem:[#allocation8 + $0x48] sm:$0xff] }
  0x21   :  { %177 = vmatpush.msra.mxu0 %v144_v12  ;;  %221 = vmatpush.msra.mxu2 %v112_v19  ;;  %v126_v32 = vld [vmem:[#allocation8 + $0xd0] sm:$0xff]  ;;  %v139_v33 = vld [vmem:[#allocation8 + $0x128] sm:$0xff]  ;;  %v108_v35 = vld [vmem:[#allocation8 + $0x40] sm:$0xff] }
  0x22   :  { %197 = vmatpush.msra.mxu1 %v160_v13  ;;  %241 = vmatpush.msra.mxu3 %v128_v24  ;;  %v155_v34 = vld [vmem:[#allocation8 + $0x1a8] sm:$0xff]  ;;  %v138_v37 = vld [vmem:[#allocation8 + $0x120] sm:$0xff]  ;;  %v107_v39 = vld [vmem:[#allocation8 + $0x38] sm:$0xff] }
  0x23   :  { %178 = vmatpush.msra.mxu0 %v143_v17  ;;  %222 = vmatpush.msra.mxu2 %v111_v23  ;;  %v125_v36 = vld [vmem:[#allocation8 + $0xc8] sm:$0xff]  ;;  %v154_v38 = vld [vmem:[#allocation8 + $0x1a0] sm:$0xff]  ;;  %v137_v41 = vld [vmem:[#allocation8 + $0x118] sm:$0xff] }
  0x24   :  { %198 = vmatpush.msra.mxu1 %v159_v18  ;;  %242 = vmatpush.msra.mxu3 %v127_v28  ;;  %v124_v40 = vld [vmem:[#allocation8 + $0xc0] sm:$0xff]  ;;  %v153_v42 = vld [vmem:[#allocation8 + $0x198] sm:$0xff]  ;;  %v106_v43 = vld [vmem:[#allocation8 + $0x30] sm:$0xff] }
  0x25   :  { %179 = vmatpush.msra.mxu0 %v142_v21  ;;  %223 = vmatpush.msra.mxu2 %v110_v27  ;;  %v123_v44 = vld [vmem:[#allocation8 + $0xb8] sm:$0xff]  ;;  %v136_v45 = vld [vmem:[#allocation8 + $0x110] sm:$0xff]  ;;  %v105_v47 = vld [vmem:[#allocation8 + $0x28] sm:$0xff] }
  0x26   :  { %199 = vmatpush.msra.mxu1 %v158_v22  ;;  %243 = vmatpush.msra.mxu3 %v126_v32  ;;  %v152_v46 = vld [vmem:[#allocation8 + $0x190] sm:$0xff]  ;;  %v135_v49 = vld [vmem:[#allocation8 + $0x108] sm:$0xff]  ;;  %v104_v51 = vld [vmem:[#allocation8 + $0x20] sm:$0xff] }
  0x27   :  { %180 = vmatpush.msra.mxu0 %v141_v25  ;;  %224 = vmatpush.msra.mxu2 %v109_v31  ;;  %v122_v48 = vld [vmem:[#allocation8 + $0xb0] sm:$0xff]  ;;  %v151_v50 = vld [vmem:[#allocation8 + $0x188] sm:$0xff]  ;;  %v134_v53 = vld [vmem:[#allocation8 + $0x100] sm:$0xff] }
  0x28   :  { %200 = vmatpush.msra.mxu1 %v157_v26  ;;  %244 = vmatpush.msra.mxu3 %v125_v36  ;;  %v121_v52 = vld [vmem:[#allocation8 + $0xa8] sm:$0xff]  ;;  %v150_v54 = vld [vmem:[#allocation8 + $0x180] sm:$0xff]  ;;  %v132_v55 = vld [vmem:[#allocation5] sm:$0xf] }
  0x29   :  { %181 = vmatpush.msra.mxu0 %v140_v29  ;;  %225 = vmatpush.msra.mxu2 %v108_v35  ;;  %v275_v56 = vld [vmem:[#allocation8 + $0x278] sm:$0xff]  ;;  %167 = vst [vmem:[#allocation1] ss:$4 sm:$0xff] %v132_v55  ;;  %v120_v59 = vld [vmem:[#allocation8 + $0xa0] sm:$0xff]  ;;  %v274_v60 = vld [vmem:[#allocation8 + $0x270] sm:$0xff] }
  0x2a   :  { %201 = vmatpush.msra.mxu1 %v156_v30  ;;  %245 = vmatpush.msra.mxu3 %v124_v40  ;;  %v291_v57 = vld [vmem:[#allocation8 + $0x2f8] sm:$0xff]  ;;  %v290_v61 = vld [vmem:[#allocation8 + $0x2f0] sm:$0xff]  ;;  %v273_v62 = vld [vmem:[#allocation8 + $0x268] sm:$0xff] }
  0x2b   :  { %182 = vmatpush.msra.mxu0 %v139_v33  ;;  %226 = vmatpush.msra.mxu2 %v107_v39  ;;  %v103_v58 = vld [vmem:[#allocation8 + $0x18] sm:$0xff]  ;;  %v289_v63 = vld [vmem:[#allocation8 + $0x2e8] sm:$0xff]  ;;  %v102_v0 = vld [vmem:[#allocation8 + $0x10] sm:$0xff] }
  0x2c   :  { %202 = vmatpush.msra.mxu1 %v155_v34  ;;  %246 = vmatpush.msra.mxu3 %v123_v44  ;;  %v119_v1 = vld [vmem:[#allocation8 + $0x98] sm:$0xff]  ;;  %v272_v2 = vld [vmem:[#allocation8 + $0x260] sm:$0xff]  ;;  %v101_v4 = vld [vmem:[#allocation8 + $0x8] sm:$0xff] }
  0x2d   :  { %183 = vmatpush.msra.mxu0 %v138_v37  ;;  %227 = vmatpush.msra.mxu2 %v106_v43  ;;  %v288_v3 = vld [vmem:[#allocation8 + $0x2e0] sm:$0xff]  ;;  %v118_v5 = vld [vmem:[#allocation8 + $0x90] sm:$0xff]  ;;  %v117_v8 = vld [vmem:[#allocation8 + $0x88] sm:$0xff] }
  0x2e   :  { %203 = vmatpush.msra.mxu1 %v154_v38  ;;  %247 = vmatpush.msra.mxu3 %v122_v48  ;;  %v100_v6 = vld [vmem:[#allocation8] sm:$0xff]  ;;  %v99_v7 = vld [vmem:[#allocation2] sm:$0xf]  ;;  %v271_v11 = vld [vmem:[#allocation8 + $0x258] sm:$0xff] }
  0x2f   :  { %184 = vmatpush.msra.mxu0 %v137_v41  ;;  %228 = vmatpush.msra.mxu2 %v105_v47  ;;  %v287_v12 = vld [vmem:[#allocation8 + $0x2d8] sm:$0xff]  ;;  %v116_v13 = vld [vmem:[#allocation8 + $0x80] sm:$0xff]  ;;  %v270_v14 = vld [vmem:[#allocation8 + $0x250] sm:$0xff] }
  0x30   :  { %204 = vmatpush.msra.mxu1 %v153_v42  ;;  %248 = vmatpush.msra.mxu3 %v121_v52  ;;  %v168_v9 = vld.sshfl [vmem:[#allocation1] sm:$0xff pattern:$0x73625140]  ;;  %v169_v10 = vld.sshfl [vmem:[#allocation1 + $0x8] sm:$0xff pattern:$0x73625140] }
  0x31   :  { %185 = vmatpush.msra.mxu0 %v136_v45  ;;  %229 = vmatpush.msra.mxu2 %v104_v51  ;;  %213 = vst [vmem:[#allocation1] ss:$4 sm:$0xff] %v99_v7  ;;  %v286_v15 = vld [vmem:[#allocation8 + $0x2d0] sm:$0xff]  ;;  %v360_v16 = vld [vmem:[#allocation10 + $0x78] sm:$0xff]  ;;  %v269_v17 = vld [vmem:[#allocation8 + $0x248] sm:$0xff] }
  0x32   :  { %205 = vmatpush.msra.mxu1 %v152_v46  ;;  %249 = vmatpush.msra.mxu3 %v120_v59  ;;  %v285_v18 = vld [vmem:[#allocation8 + $0x2c8] sm:$0xff]  ;;  %v258_v19 = vld [vmem:[#allocation7] sm:$0xf]  ;;  %v268_v20 = vld [vmem:[#allocation8 + $0x240] sm:$0xff] }
  0x33   :  { %186 = vmatpush.msra.mxu0 %v135_v49  ;;  %230 = vmatpush.msra.mxu2 %v103_v58  ;;  %v284_v21 = vld [vmem:[#allocation8 + $0x2c0] sm:$0xff]  ;;  %v359_v22 = vld [vmem:[#allocation10 + $0x70] sm:$0xff]  ;;  %v267_v25 = vld [vmem:[#allocation8 + $0x238] sm:$0xff] }
  0x34   :  { %206 = vmatpush.msra.mxu1 %v151_v50  ;;  %250 = vmatpush.msra.mxu3 %v119_v1  ;;  %v283_v26 = vld [vmem:[#allocation8 + $0x2b8] sm:$0xff]  ;;  %v358_v27 = vld [vmem:[#allocation10 + $0x68] sm:$0xff]  ;;  %v266_v28 = vld [vmem:[#allocation8 + $0x230] sm:$0xff] }
  0x35   :  { %187 = vmatpush.msra.mxu0 %v134_v53  ;;  %231 = vmatpush.msra.mxu2 %v102_v0  ;;  %v282_v29 = vld [vmem:[#allocation8 + $0x2b0] sm:$0xff]  ;;  %v357_v30 = vld [vmem:[#allocation10 + $0x60] sm:$0xff]  ;;  %v265_v31 = vld [vmem:[#allocation8 + $0x228] sm:$0xff] }
  0x36   :  { %207 = vmatpush.msra.mxu1 %v150_v54  ;;  %251 = vmatpush.msra.mxu3 %v118_v5  ;;  %v281_v32 = vld [vmem:[#allocation8 + $0x2a8] sm:$0xff]  ;;  %v356_v33 = vld [vmem:[#allocation10 + $0x58] sm:$0xff]  ;;  %v264_v34 = vld [vmem:[#allocation8 + $0x220] sm:$0xff] }
  0x37   :  { %298 = vmatpush.msrb.mxu0 %v275_v56  ;;  %232 = vmatpush.msra.mxu2 %v101_v4  ;;  %v280_v35 = vld [vmem:[#allocation8 + $0x2a0] sm:$0xff]  ;;  %v355_v36 = vld [vmem:[#allocation10 + $0x50] sm:$0xff]  ;;  %v263_v37 = vld [vmem:[#allocation8 + $0x218] sm:$0xff] }
  0x38   :  { %318 = vmatpush.msrb.mxu1 %v291_v57  ;;  %252 = vmatpush.msra.mxu3 %v117_v8  ;;  %v214_v23 = vld.sshfl [vmem:[#allocation1] sm:$0xff pattern:$0x73625140]  ;;  %v215_v24 = vld.sshfl [vmem:[#allocation1 + $0x8] sm:$0xff pattern:$0x73625140] }
  0x39   :  { %299 = vmatpush.msrb.mxu0 %v274_v60  ;;  %233 = vmatpush.msra.mxu2 %v100_v6  ;;  %293 = vst [vmem:[#allocation1] ss:$4 sm:$0xff] %v258_v19  ;;  %v279_v38 = vld [vmem:[#allocation8 + $0x298] sm:$0xff]  ;;  %v354_v39 = vld [vmem:[#allocation10 + $0x48] sm:$0xff]  ;;  %v262_v40 = vld [vmem:[#allocation8 + $0x210] sm:$0xff] }
  0x3a   :  { %319 = vmatpush.msrb.mxu1 %v290_v61  ;;  %253 = vmatpush.msra.mxu3 %v116_v13  ;;  %v278_v41 = vld [vmem:[#allocation8 + $0x290] sm:$0xff]  ;;  %v261_v42 = vld [vmem:[#allocation8 + $0x208] sm:$0xff]  ;;  %v260_v44 = vld [vmem:[#allocation8 + $0x200] sm:$0xff] }
  0x3b   :  { %300 = vmatpush.msrb.mxu0 %v273_v62  ;;  %208 = vmatmul.f32.vlgmr.msra.gmra.mxu1 %v169_v10  ;;  %v277_v43 = vld [vmem:[#allocation8 + $0x288] sm:$0xff]  ;;  %v276_v45 = vld [vmem:[#allocation8 + $0x280] sm:$0xff]  ;;  %v352_v49 = vld [vmem:[#allocation10 + $0x38] sm:$0xff] }
  0x3c   :  { %320 = vmatpush.msrb.mxu1 %v289_v63  ;;  %188 = vmatmul.f32.vlgmr.msra.gmra.mxu0 %v168_v9  ;;  %v353_v48 = vld [vmem:[#allocation10 + $0x40] sm:$0xff]  ;;  %v351_v50 = vld [vmem:[#allocation10 + $0x30] sm:$0xff]  ;;  %v350_v51 = vld [vmem:[#allocation10 + $0x28] sm:$0xff] }
  0x3d   :  { %301 = vmatpush.msrb.mxu0 %v272_v2  ;;  %365 = vmatpush.msrb.mxu2 %v360_v16  ;;  %v349_v52 = vld [vmem:[#allocation10 + $0x20] sm:$0xff]  ;;  %v348_v53 = vld [vmem:[#allocation10 + $0x18] sm:$0xff]  ;;  %v347_v54 = vld [vmem:[#allocation10 + $0x10] sm:$0xff] }
  0x3e   :  { %321 = vmatpush.msrb.mxu1 %v288_v3  ;;  %234 = vmatmul.f32.vlgmr.msra.gmra.mxu2 %v214_v23  ;;  %v346_v55 = vld [vmem:[#allocation10 + $0x8] sm:$0xff]  ;;  %v345_v56 = vld [vmem:[#allocation10] sm:$0xff] }
  0x3f   :  { %302 = vmatpush.msrb.mxu0 %v271_v11  ;;  %254 = vmatmul.f32.vlgmr.msra.gmra.mxu3 %v215_v24  ;;  %v414_v3 = vld [vmem:[%s644_s4] ss:$0 sm:$0xff] }
  0x40   :  { %322 = vmatpush.msrb.mxu1 %v287_v12  ;;  %366 = vmatpush.msrb.mxu2 %v359_v22  ;;  %v294_v46 = vld.sshfl [vmem:[#allocation1] sm:$0xff pattern:$0x73625140]  ;;  %v295_v47 = vld.sshfl [vmem:[#allocation1 + $0x8] sm:$0xff pattern:$0x73625140] }
  0x41   :  { %303 = vmatpush.msrb.mxu0 %v270_v14  ;;  %v415_v7 = vld [vmem:[%s646_s6] ss:$0 sm:$0xff] }
  0x42   :  { %323 = vmatpush.msrb.mxu1 %v286_v15  ;;  %367 = vmatpush.msrb.mxu2 %v358_v27 }
  0x43   :  { %304 = vmatpush.msrb.mxu0 %v269_v17 }
  0x44   :  { %324 = vmatpush.msrb.mxu1 %v285_v18  ;;  %368 = vmatpush.msrb.mxu2 %v357_v30 }
  0x45   :  { %305 = vmatpush.msrb.mxu0 %v268_v20 }
  0x46   :  { %325 = vmatpush.msrb.mxu1 %v284_v21  ;;  %369 = vmatpush.msrb.mxu2 %v356_v33 }
  0x47   :  { %306 = vmatpush.msrb.mxu0 %v267_v25 }
  0x48   :  { %326 = vmatpush.msrb.mxu1 %v283_v26  ;;  %370 = vmatpush.msrb.mxu2 %v355_v36 }
  0x49   :  { %307 = vmatpush.msrb.mxu0 %v266_v28 }
  0x4a   :  { %327 = vmatpush.msrb.mxu1 %v282_v29  ;;  %371 = vmatpush.msrb.mxu2 %v354_v39 }
  0x4b   :  { %308 = vmatpush.msrb.mxu0 %v265_v31 }
  0x4c   :  { %328 = vmatpush.msrb.mxu1 %v281_v32  ;;  %372 = vmatpush.msrb.mxu2 %v353_v48 }
  0x4d   :  { %309 = vmatpush.msrb.mxu0 %v264_v34 }
  0x4e   :  { %329 = vmatpush.msrb.mxu1 %v280_v35  ;;  %373 = vmatpush.msrb.mxu2 %v352_v49 }
  0x4f   :  { %310 = vmatpush.msrb.mxu0 %v263_v37 }
  0x50   :  { %330 = vmatpush.msrb.mxu1 %v279_v38  ;;  %374 = vmatpush.msrb.mxu2 %v351_v50 }
  0x51   :  { %311 = vmatpush.msrb.mxu0 %v262_v40 }
  0x52   :  { %331 = vmatpush.msrb.mxu1 %v278_v41  ;;  %375 = vmatpush.msrb.mxu2 %v350_v51 }
  0x53   :  { %312 = vmatpush.msrb.mxu0 %v261_v42 }
  0x54   :  { %332 = vmatpush.msrb.mxu1 %v277_v43  ;;  %376 = vmatpush.msrb.mxu2 %v349_v52 }
  0x55   :  { %313 = vmatpush.msrb.mxu0 %v260_v44 }
  0x56   :  { %333 = vmatpush.msrb.mxu1 %v276_v45  ;;  %314 = vmatmul.f32.vlgmr.msrb.gmra.mxu0 %v294_v46 }
  0x57   :  { %334 = vmatmul.f32.vlgmr.msrb.gmra.mxu1 %v295_v47  ;;  %377 = vmatpush.msrb.mxu2 %v348_v53 }
  0x59   :  { %378 = vmatpush.msrb.mxu2 %v347_v54 }
  0x5b   :  { %379 = vmatpush.msrb.mxu2 %v346_v55 }
  0x5d   :  { %380 = vmatpush.msrb.mxu2 %v345_v56 }
  0xb8   :  { %v209_v58 = vpop.f32.mrf.mxu1 }
  0xb9   :  { %v189_v57 = vpop.f32.mrf.mxu0 }
  0xba   :  { %v210_v59 = vadd.f32 %v209_v58, %v189_v57 }
  0xc1   :  { %v235_v60 = vpop.f32.mrf.mxu2 }
  0xc2   :  { %v236_v61 = vadd.f32 %v235_v60, %v210_v59  ;;  %v255_v62 = vpop.f32.mrf.mxu3 }
  0xc4   :  { %v256_v1 = vadd.f32 %v255_v62, %v236_v61 }
  0xd3   :  { %v315_v63 = vpop.f32.mrf.mxu0 }
  0xd4   :  { %v335_v0 = vpop.f32.mrf.mxu1 }
  0xd5   :  { %v336_v2 = vadd.f32 %v335_v0, %v315_v63 }
  0xd7   :  { %v338_v4 = vadd.f32 %v336_v2, %v256_v1 }
  0xd9   :  { %v343_v5 = vadd.f32 %v414_v3, %v338_v4 }
  0xdb   :  { %v344_v6 = vmax.f32 %v343_v5, 0.0 }
  0xdd   :  { %381 = vmatmul.f32.vlgmr.msrb.gmra.mxu2 %v344_v6 }
 0x160   :  { %v382_v8 = vpop.f32.mrf.mxu2 }
 0x161   :  { %v383_v9 = vadd.f32 %v415_v7, %v382_v8 }
 0x163   :  { %v385_v10 = vmax.f32 %v383_v9, 0.0 }
 0x165   :  { %386 = vst [vmem:[#allocation11] sm:$0x3] %v385_v10 }
 0x166   :  { %397 = dma.vmem_to_hbm [thread:$0]  %s393_s28, 32, %s395_s8, [#allocation4]  }
 0x167   :  { %566 = dma.done.wait [#allocation4], 32  }
 0x168   :  { %567 = vsyncadd [#allocation4], 4294967264 }
 0x169   :  { %402 = vsyncpa [#allocation3], 1 }
 0x16a   :  { %403 = vsyncpa [#allocation6], 1 }
 0x16b   :  { %404 = vsyncpa [#allocation9], 1 }
 0x16c   :  { %405 = vsyncpa [#allocation4], 1 }

</bundles_post_ra>
